<compile_context>
chip_gen: v7x
topology: tpu7x:2x2x1
jax: 0.10.0
libtpu: 0.0.40
codegen_flags: <defaults>
</compile_context>

<pallas_src>
import jax
import jax.numpy as jnp
from jax.experimental import pallas as pl
from jax.experimental.pallas import tpu as pltpu


def _scse_apply_kernel(x_ref, cgate_ref, ws_ref, bs_ref, o_ref):
    # x_ref:     (bn, C, T)  current (batch-block, HW-tile) block
    # cgate_ref: (bn, C, 1)  precomputed channel (cSE) gate, f32
    # ws_ref:    (1,  C, 1)  sSE 1x1-conv weight, f32
    # bs_ref:    (1, 1)      sSE 1x1-conv bias (SMEM scalar)
    x = x_ref[...].astype(jnp.float32)                                # (bn, C, T)
    w = ws_ref[...]                                                   # (1,  C, 1) f32

    # sSE gate: per-pixel channel reduction.  VPU multiply + sublane reduce
    # (MXU is left idle on purpose -- the kernel is HBM-bound and an M=1 matmul
    # would waste MXU rows / add MRF-pop latency on v5e).
    logits = jnp.sum(x * w, axis=1, keepdims=True) + bs_ref[0, 0]     # (bn, 1, T)
    s_gate = jax.nn.sigmoid(logits)

    # x*cse + x*sse == x * (cse + sse); broadcast (bn,C,1) + (bn,1,T) -> (bn,C,T).
    gate = cgate_ref[...] + s_gate
    o_ref[...] = (x * gate).astype(o_ref.dtype)


def _choose_blocks(N, C, HW, itemsize, target_bytes):
    """Pick (bn, tile, num_tiles) so each grid step moves ~target_bytes."""
    row_bytes = max(C * itemsize, 1)
    lanes = max(target_bytes // row_bytes, 128)
    if lanes >= HW:
        tile = HW                    # single HW tile: block dim == full array dim
        num_tiles = 1
    else:
        tile = max((int(lanes) // 128) * 128, 128)   # lane-dense interior tiles
        num_tiles = int(pl.cdiv(HW, tile))           # ragged tail handled by Pallas

    if num_tiles == 1:
        # Whole image fits in one tile -> fold batch so a step still moves >=~1 MiB.
        bn_want = int(min(max(target_bytes // max(C * tile * itemsize, 1), 1), N))
        bn = 1
        for d in range(bn_want, 0, -1):              # largest divisor of N <= bn_want
            if N % d == 0:
                bn = d
                break
    else:
        bn = 1
    return bn, tile, num_tiles


def scse_block(x, w1, b1, w2, b2, ws, bs, *, target_block_bytes=2 << 20):
    """SCSEBlock forward.

    x:  (N, C, H, W)        -- f32 or bf16 (gate math is always f32 in-kernel)
    w1: (C//r, C), b1: (C//r,)   -- cSE conv 1 (1x1)
    w2: (C, C//r), b2: (C,)      -- cSE conv 2 (1x1)
    ws: (1, C),    bs: (1, 1)    -- sSE conv   (1x1)
    """
    N, C, H, W = x.shape
    HW = H * W
    itemsize = jnp.dtype(x.dtype).itemsize

    # ---- cSE gate precomputed in plain XLA (tiny; keeps it out of the hot loop).
    pooled = jnp.mean(x.astype(jnp.float32), axis=(2, 3))             # (N, C)
    h = jnp.maximum(pooled @ w1.T + b1[None, :], 0.0)                 # (N, C//r)
    c_gate = jax.nn.sigmoid(h @ w2.T + b2[None, :])                   # (N, C)
    c_gate = c_gate[:, :, None].astype(jnp.float32)                   # (N, C, 1)

    ws_col = ws.reshape(1, C, 1).astype(jnp.float32)                  # (1, C, 1)
    bs_sc = bs.reshape(1, 1).astype(jnp.float32)                      # (1, 1) SMEM

    # ---- byte-sized tiling (no padding, no output slice).
    bn, tile, num_tiles = _choose_blocks(N, C, HW, itemsize, target_block_bytes)
    n_batch_blocks = int(pl.cdiv(N, bn))

    x_flat = x.reshape(N, C, HW)

    # ---- generation-aware VMEM budget (double-buffered in+out + f32 temporaries).
    block_bytes = bn * C * tile * itemsize
    f32_bytes = bn * C * tile * 4
    vmem_need = 4 * block_bytes + 3 * f32_bytes + (2 << 20)
    try:
        phys_vmem = pltpu.get_tpu_info().vmem_capacity_bytes
    except Exception:  # be conservative if the query is unavailable
        phys_vmem = 64 << 20
    cap = (32 << 20) if phys_vmem <= (64 << 20) else (48 << 20)
    vmem_limit = int(min(max(vmem_need, 8 << 20), cap))

    out = pl.pallas_call(
        _scse_apply_kernel,
        out_shape=jax.ShapeDtypeStruct((N, C, HW), x.dtype),
        grid_spec=pltpu.PrefetchScalarGridSpec(
            num_scalar_prefetch=0,
            # Tile axis leading so the v7x megacore split hits the fat axis
            # even when N is 1-2; both axes are independent ("parallel").
            grid=(num_tiles, n_batch_blocks),
            in_specs=[
                pl.BlockSpec((bn, C, tile), lambda t, b: (b, 0, t)),   # x tile
                pl.BlockSpec((bn, C, 1), lambda t, b: (b, 0, 0)),      # cSE gate
                pl.BlockSpec((1, C, 1), lambda t, b: (0, 0, 0)),       # sSE weight
                pl.BlockSpec(memory_space=pltpu.MemorySpace.SMEM),     # sSE bias
            ],
            out_specs=pl.BlockSpec((bn, C, tile), lambda t, b: (b, 0, t)),
        ),
        compiler_params=pltpu.CompilerParams(
            dimension_semantics=("parallel", "parallel"),
            vmem_limit_bytes=vmem_limit,
        ),
    )(x_flat, c_gate, ws_col, bs_sc)

    return out.reshape(N, C, H, W)


def _reference(x, w1, b1, w2, b2, ws, bs):
    # Pure-JAX reference reproducing the PyTorch forward (f32 math).
    x = x.astype(jnp.float32)
    pooled = jnp.mean(x, axis=(2, 3))                                 # (N, C)
    h = jnp.maximum(pooled @ w1.T + b1[None, :], 0.0)                 # (N, C//r)
    cse = jax.nn.sigmoid(h @ w2.T + b2[None, :])[:, :, None, None]    # (N, C, 1, 1)
    sse = jax.nn.sigmoid(
        jnp.einsum("nchw,oc->nohw", x, ws) + bs[0, 0]
    )                                                                 # (N, 1, H, W)
    return x * cse + x * sse


if __name__ == "__main__":
    # reduction=12 requires C % 12 == 0 -> C=24, Cr=2.
    N, C, H, W = 2, 24, 16, 16
    reduction = 12
    Cr = C // reduction

    key = jax.random.PRNGKey(0)
    kx, k1, k2, k3, k4, k5, k6, k7 = jax.random.split(key, 8)

    x = jax.random.normal(kx, (N, C, H, W), dtype=jnp.float32)

    # PyTorch 1x1-conv weights squeezed to 2D, biases to 1D.
    w1 = jax.random.normal(k1, (Cr, C), dtype=jnp.float32) * 0.2      # conv C -> C//r
    b1 = jax.random.normal(k2, (Cr,), dtype=jnp.float32) * 0.1
    w2 = jax.random.normal(k3, (C, Cr), dtype=jnp.float32) * 0.2      # conv C//r -> C
    b2 = jax.random.normal(k4, (C,), dtype=jnp.float32) * 0.1
    ws = jax.random.normal(k5, (1, C), dtype=jnp.float32) * 0.2       # conv C -> 1
    bs = jax.random.normal(k6, (1, 1), dtype=jnp.float32) * 0.1

    # --- f32 path (single HW tile, batch folded into the block).
    out = jax.block_until_ready(scse_block(x, w1, b1, w2, b2, ws, bs))
    ref = _reference(x, w1, b1, w2, b2, ws, bs)
    assert out.shape == ref.shape
    assert jnp.allclose(out, ref, atol=1e-5, rtol=1e-5), "f32 mismatch vs reference"

    # --- ragged-HW-tile path: HW=400, force 128-lane tiles -> partial final block.
    x2 = jax.random.normal(k7, (1, C, 20, 20), dtype=jnp.float32)
    out2 = jax.block_until_ready(
        scse_block(x2, w1, b1, w2, b2, ws, bs, target_block_bytes=C * 128 * 4)
    )
    ref2 = _reference(x2, w1, b1, w2, b2, ws, bs)
    assert jnp.allclose(out2, ref2, atol=1e-5, rtol=1e-5), "ragged-tile mismatch"

    # --- bf16 I/O path (halved HBM traffic; gate math stays f32 in-kernel).
    xb = x.astype(jnp.bfloat16)
    outb = jax.block_until_ready(scse_block(xb, w1, b1, w2, b2, ws, bs))
    refb = _reference(xb.astype(jnp.float32), w1, b1, w2, b2, ws, bs)
    assert outb.dtype == jnp.bfloat16
    assert jnp.allclose(outb.astype(jnp.float32), refb, atol=3e-2, rtol=3e-2), \
        "bf16 mismatch vs reference"

    print("KERNEL_OK")
</pallas_src>

<mosaic_0001>
module attributes {stable_mosaic.version = 11 : i64} {
  func.func @_scse_apply_kernel(%arg0: i32, %arg1: i32, %arg2: memref<2x24x256xf32, #tpu.memory_space<vmem>>, %arg3: memref<2x24x1xf32, #tpu.memory_space<vmem>>, %arg4: memref<1x24x1xf32, #tpu.memory_space<vmem>>, %arg5: memref<1x1xf32, #tpu.memory_space<smem>>, %arg6: memref<2x24x256xf32, #tpu.memory_space<vmem>>) attributes {dimension_semantics = [#tpu.dimension_semantics<parallel>, #tpu.dimension_semantics<parallel>], iteration_bounds = array<i64: 1, 1>, scalar_prefetch = 0 : i64, scratch_operands = 0 : i64, tpu.core_type = #tpu.core_type<tc>, window_params = [{transform_indices = @transform_0, window_bounds = array<i64: 2, 24, 256>}, {transform_indices = @transform_1, window_bounds = array<i64: 2, 24, 1>}, {pipeline_mode = #tpu.pipeline_mode<synchronous>, transform_indices = @transform_2, window_bounds = array<i64: 1, 24, 1>}, {transform_indices = @transform_3, window_bounds = array<i64: 1, 1>}, {transform_indices = @transform_4, window_bounds = array<i64: 2, 24, 256>}]} {
    %c0 = arith.constant 0 : index
    %c0_0 = arith.constant 0 : index
    %c0_1 = arith.constant 0 : index
    %0 = vector.load %arg2[%c0, %c0_0, %c0_1] : memref<2x24x256xf32, #tpu.memory_space<vmem>>, vector<2x24x256xf32>
    %c0_2 = arith.constant 0 : index
    %c0_3 = arith.constant 0 : index
    %c0_4 = arith.constant 0 : index
    %1 = vector.load %arg4[%c0_2, %c0_3, %c0_4] : memref<1x24x1xf32, #tpu.memory_space<vmem>>, vector<1x24x1xf32>
    %2 = vector.broadcast %1 : vector<1x24x1xf32> to vector<2x24x256xf32>
    %3 = arith.mulf %0, %2 : vector<2x24x256xf32>
    %cst = arith.constant dense<0.000000e+00> : vector<2x256xf32>
    %4 = vector.multi_reduction <add>, %3, %cst [1] : vector<2x24x256xf32> to vector<2x256xf32>
    %5 = vector.shape_cast %4 : vector<2x256xf32> to vector<2x1x256xf32>
    %c0_5 = arith.constant 0 : index
    %c0_6 = arith.constant 0 : index
    %6 = memref.load %arg5[%c0_5, %c0_6] : memref<1x1xf32, #tpu.memory_space<smem>>
    %7 = vector.broadcast %6 : f32 to vector<2x1x256xf32>
    %8 = arith.addf %5, %7 : vector<2x1x256xf32>
    %9 = arith.negf %8 : vector<2x1x256xf32>
    %10 = math.exp %9 : vector<2x1x256xf32>
    %cst_7 = arith.constant 1.000000e+00 : f32
    %11 = vector.broadcast %cst_7 : f32 to vector<2x1x256xf32>
    %12 = arith.addf %11, %10 : vector<2x1x256xf32>
    %13 = arith.divf %11, %12 : vector<2x1x256xf32>
    %c0_8 = arith.constant 0 : index
    %c0_9 = arith.constant 0 : index
    %c0_10 = arith.constant 0 : index
    %14 = vector.load %arg3[%c0_8, %c0_9, %c0_10] : memref<2x24x1xf32, #tpu.memory_space<vmem>>, vector<2x24x1xf32>
    %15 = vector.broadcast %14 : vector<2x24x1xf32> to vector<2x24x256xf32>
    %16 = vector.broadcast %13 : vector<2x1x256xf32> to vector<2x24x256xf32>
    %17 = arith.addf %15, %16 : vector<2x24x256xf32>
    %18 = arith.mulf %0, %17 : vector<2x24x256xf32>
    %c0_11 = arith.constant 0 : index
    %c0_12 = arith.constant 0 : index
    %c0_13 = arith.constant 0 : index
    %19 = vector.load %arg6[%c0_11, %c0_12, %c0_13] : memref<2x24x256xf32, #tpu.memory_space<vmem>>, vector<2x24x256xf32>
    tpu.vector_store %arg6[%c0_11, %c0_12, %c0_13], %18 {strides = array<i32>} : memref<2x24x256xf32, #tpu.memory_space<vmem>>, vector<2x24x256xf32>,
    return
  }
  func.func @transform_0(%arg0: i32, %arg1: i32) -> (i32, i32, i32) {
    %c0_i32 = arith.constant 0 : i32
    %c0_i32_0 = arith.constant 0 : i32
    return %arg1, %c0_i32, %arg0 : i32, i32, i32
  }
  func.func @transform_1(%arg0: i32, %arg1: i32) -> (i32, i32, i32) {
    %c0_i32 = arith.constant 0 : i32
    %c0_i32_0 = arith.constant 0 : i32
    %c0_i32_1 = arith.constant 0 : i32
    return %arg1, %c0_i32, %c0_i32_0 : i32, i32, i32
  }
  func.func @transform_2(%arg0: i32, %arg1: i32) -> (i32, i32, i32) {
    %c0_i32 = arith.constant 0 : i32
    %c0_i32_0 = arith.constant 0 : i32
    %c0_i32_1 = arith.constant 0 : i32
    %c0_i32_2 = arith.constant 0 : i32
    return %c0_i32, %c0_i32_0, %c0_i32_1 : i32, i32, i32
  }
  func.func @transform_3(%arg0: i32, %arg1: i32) -> (i32, i32) {
    %c0_i32 = arith.constant 0 : i32
    %c0_i32_0 = arith.constant 0 : i32
    %c0_i32_1 = arith.constant 0 : i32
    return %c0_i32, %c0_i32_0 : i32, i32
  }
  func.func @transform_4(%arg0: i32, %arg1: i32) -> (i32, i32, i32) {
    %c0_i32 = arith.constant 0 : i32
    %c0_i32_0 = arith.constant 0 : i32
    return %arg1, %c0_i32, %arg0 : i32, i32, i32
  }
}

</mosaic_0001>

<bundles_post_ra>
// kernel: tpu_custom_call.1
= control target key start
LH: loop header
LB: loop body
LE: loop exit
PB: predicated region body
PF: predicated region fallthrough
CT: control target
= control target key end

     0   :  { %10 = vsyncpa [#allocation4], 0  ;;  %s439_s0 = inlined_call_operand.hbm [shape: f32[2,24,256], index: 0, kind: input, shape index: {}]   ;;  %s440_s1 = inlined_call_operand.vmem [shape: f32[2,24,1], index: 1, kind: input, shape index: {}]   ;;  %s441_s2 = inlined_call_operand.vmem [shape: f32[1,24,1], index: 2, kind: input, shape index: {}]   ;;  %s442_s3 = inlined_call_operand.<no memory space> [shape: f32[1,1], index: 3, kind: input, shape index: {}]   ;;  %s443_s4 = inlined_call_operand.hbm [shape: f32[2,24,256], index: 4, kind: output, shape index: {}]  }
   0x1   :  { %11 = vsyncpa [#allocation5], 0  ;;  %s301_s15 = smov [#allocation3]   ;;  %s253_s19 = scalar_lea.hbm %s439_s0, 1536 }
   0x2   :  { %s17_s16 = sshll.u32 %s301_s15, 4  ;;  %p254_p0 = scmp.ne.s32.totalorder %s439_s0, %s253_s19  ;;  %s18_s16 = int_to_ptr.vmem [resolvable:$true] %s17_s16 }
   0x3   :  { %p257_p1 = scmp.lt.u32.totalorder %s253_s19, %s439_s0 }
   0x5   :  { %p259_p2 = pnand %p257_p1, %p254_p0 }
   0x7   :  { %262 = shalt.err (!%p259_p2)
}
   0x8   :  { %s263_s24 = scalar_lea.vmem %s18_s16, 1536  ;;  %p268_p4 = scmp.lt.s32.totalorder %s18_s16, %s18_s16 }
   0x9   :  { %p264_p3 = scmp.ne.s32.totalorder %s18_s16, %s263_s24  ;;  %p269_p5 = scmp.lt.s32.totalorder %s263_s24, %s263_s24 }
   0xb   :  { %p270_p6 = por %p269_p5, %p268_p4 }
   0xd   :  { %p271_p7 = pnand %p270_p6, %p264_p3 }
   0xf   :  { %274 = shalt.err (!%p271_p7)
}
  0x10   :  { %s302_s25 = smov 256   ;;  %s303_s26 = smov 16  }
  0x11   :  { %23 = dma.hbm_to_vmem [thread:$0]  %s439_s0, 1536, %s18_s16, [#allocation4], %s302_s25, %s302_s25, %s303_s26  }
  0x12   :  { %297 = dma.done.wait [#allocation4], 1536  }
  0x13   :  { %298 = vsyncadd [#allocation4], 4294965760  ;;  %v304_v0 = vmov 0   ;;  %v47_v1 = vld [vmem:[%s441_s2 + $0x10] sm:$0xff]  ;;  %v45_v2 = vld [vmem:[%s441_s2] sm:$0xff] }
  0x14   :  { %236 = vset.pattern.permute.xlu1 %v304_v0  ;;  %235 = vset.pattern.permute.xlu0 %v304_v0  ;;  %v137_v3 = vld [vmem:[%s440_s1] sm:$0xff]  ;;  %v46_v4 = vld [vmem:[%s441_s2 + $0x8] sm:$0xff]  ;;  %v139_v5 = vld [vmem:[%s440_s1 + $0x10] sm:$0xff] }
  0x15   :  { %60 = vperm.xlu1 %236, %v47_v1   ;;  %50 = vperm.xlu0 %235, %v45_v2   ;;  %v138_v6 = vld [vmem:[%s440_s1 + $0x8] sm:$0xff]  ;;  %v141_v7 = vld [vmem:[%s440_s1 + $0x20] sm:$0xff]  ;;  %v140_v8 = vld [vmem:[%s440_s1 + $0x18] sm:$0xff]  ;;  %v108_v1 = vstv %s442_s3  ;;  %s305_s3 = smov [#allocation6]  }
  0x16   :  { %v142_v9 = vld [vmem:[%s440_s1 + $0x28] sm:$0xff]  ;;  %v373_v10 = vld [vmem:[#allocation3 + $0x50] sm:$0xff]  ;;  %v375_v11 = vld [vmem:[#allocation3 + $0x58] sm:$0xff]  ;;  %s214_s20 = sshll.u32 %s305_s3, 4  ;;  %s215_s20 = int_to_ptr.vmem [resolvable:$true] %s214_s20 }
  0x17   :  { %v377_v12 = vld [vmem:[#allocation3] sm:$0xff]  ;;  %v379_v14 = vld [vmem:[#allocation3 + $0x8] sm:$0xff]  ;;  %v381_v15 = vld [vmem:[#allocation3 + $0x30] sm:$0xff]  ;;  %s275_s21 = scalar_lea.vmem %s215_s20, 1536  ;;  %p280_p9 = scmp.lt.s32.totalorder %s215_s20, %s215_s20 }
  0x18   :  { %v383_v16 = vld [vmem:[#allocation3 + $0x38] sm:$0xff]  ;;  %v385_v17 = vld [vmem:[#allocation3 + $0x10] sm:$0xff]  ;;  %v387_v18 = vld [vmem:[#allocation3 + $0x20] sm:$0xff]  ;;  %p276_p8 = scmp.ne.s32.totalorder %s215_s20, %s275_s21  ;;  %p281_p10 = scmp.lt.s32.totalorder %s275_s21, %s275_s21 }
  0x19   :  { %145 = vperm.xlu1 %236, %v137_v3   ;;  %55 = vperm.xlu0 %235, %v46_v4   ;;  %v389_v19 = vld [vmem:[#allocation3 + $0x28] sm:$0xff]  ;;  %v391_v21 = vld [vmem:[#allocation3 + $0x18] sm:$0xff]  ;;  %v393_v22 = vld [vmem:[#allocation3 + $0x40] sm:$0xff] }
  0x1a   :  { %v395_v23 = vld [vmem:[#allocation3 + $0x48] sm:$0xff]  ;;  %p282_p11 = por %p281_p10, %p280_p9 }
  0x1c   :  { %p283_p12 = pnand %p282_p11, %p276_p8 }
  0x1d   :  { %155 = vperm.xlu1 %236, %v139_v5   ;;  %150 = vperm.xlu0 %235, %v138_v6  }
  0x21   :  { %165 = vperm.xlu1 %236, %v141_v7   ;;  %160 = vperm.xlu0 %235, %v140_v8  }
  0x25   :  { %170 = vperm.xlu0 %235, %v142_v9  }
  0x94   :  { %v51_v13 = vpop.permute.xlu0 %50  ;;  %v61_v20 = vpop.permute.xlu1 %60 }
  0x95   :  { %v73_v24 = vmul.f32 %v61_v20, %v373_v10  ;;  %v74_v25 = vmul.f32 %v61_v20, %v375_v11  ;;  %v63_v26 = vmul.f32 %v51_v13, %v377_v12  ;;  %v64_v27 = vmul.f32 %v51_v13, %v379_v14 }
  0x96   :  { %v69_v28 = vmul.f32 %v51_v13, %v381_v15  ;;  %v70_v29 = vmul.f32 %v51_v13, %v383_v16  ;;  %v67_v31 = vmul.f32 %v61_v20, %v387_v18  ;;  %v68_v32 = vmul.f32 %v61_v20, %v389_v19 }
  0x98   :  { %v56_v30 = vpop.permute.xlu0 %55 }
  0x99   :  { %v65_v33 = vmul.f32 %v56_v30, %v385_v17  ;;  %v66_v34 = vmul.f32 %v56_v30, %v391_v21  ;;  %v71_v35 = vmul.f32 %v56_v30, %v393_v22  ;;  %v72_v36 = vmul.f32 %v56_v30, %v395_v23 }
  0x9b   :  { %v75_v37 = vadd.f32 %v65_v33, %v63_v26  ;;  %v83_v38 = vadd.f32 %v66_v34, %v64_v27  ;;  %v91_v39 = vadd.f32 %v71_v35, %v69_v28  ;;  %v99_v40 = vadd.f32 %v72_v36, %v70_v29 }
  0x9c   :  { %v151_v35 = vpop.permute.xlu0 %150 }
  0x9d   :  { %v76_v41 = vadd.f32 %v75_v37, %v67_v31  ;;  %v84_v42 = vadd.f32 %v83_v38, %v68_v32  ;;  %v92_v43 = vadd.f32 %v91_v39, %v73_v24  ;;  %v100_v44 = vadd.f32 %v99_v40, %v74_v25  ;;  %v146_v32 = vpop.permute.xlu1 %145 }
  0x9f   :  { %v77_v45 = vrot.slane %v76_v41, 4  ;;  %v85_v46 = vrot.slane %v84_v42, 4  ;;  %v93_v47 = vrot.slane %v92_v43, 4  ;;  %v101_v48 = vrot.slane %v100_v44, 4 }
  0xa0   :  { %v161_v37 = vpop.permute.xlu0 %160 }
  0xa1   :  { %v78_v49 = vadd.f32 %v77_v45, %v76_v41  ;;  %v86_v50 = vadd.f32 %v85_v46, %v84_v42  ;;  %v94_v51 = vadd.f32 %v93_v47, %v92_v43  ;;  %v102_v52 = vadd.f32 %v101_v48, %v100_v44  ;;  %v156_v36 = vpop.permute.xlu1 %155 }
  0xa3   :  { %v79_v53 = vrot.slane %v78_v49, 2  ;;  %v87_v54 = vrot.slane %v86_v50, 2  ;;  %v95_v55 = vrot.slane %v94_v51, 2  ;;  %v103_v56 = vrot.slane %v102_v52, 2 }
  0xa5   :  { %v80_v57 = vadd.f32 %v79_v53, %v78_v49  ;;  %v88_v58 = vadd.f32 %v87_v54, %v86_v50  ;;  %v96_v59 = vadd.f32 %v95_v55, %v94_v51  ;;  %v104_v60 = vadd.f32 %v103_v56, %v102_v52  ;;  %v166_v47 = vpop.permute.xlu1 %165 }
  0xa7   :  { %v81_v61 = vrot.slane %v80_v57, 1  ;;  %v89_v62 = vrot.slane %v88_v58, 1  ;;  %v97_v63 = vrot.slane %v96_v59, 1  ;;  %v105_v0 = vrot.slane %v104_v60, 1 }
  0xa9   :  { %v82_v2 = vadd.f32 %v81_v61, %v80_v57  ;;  %v90_v3 = vadd.f32 %v89_v62, %v88_v58  ;;  %v98_v4 = vadd.f32 %v97_v63, %v96_v59  ;;  %v106_v5 = vadd.f32 %v105_v0, %v104_v60  ;;  %v171_v57 = vpop.permute.xlu0 %170 }
  0xab   :  { %v109_v6 = vadd.f32 %v108_v1, %v82_v2  ;;  %v110_v7 = vadd.f32 %v108_v1, %v90_v3  ;;  %v111_v8 = vadd.f32 %v108_v1, %v98_v4  ;;  %v112_v9 = vadd.f32 %v108_v1, %v106_v5 }
  0xad   :  { %v226_v13 = vmul.f32 -1.442695, %v109_v6  ;;  %v227_v20 = vmul.f32 -1.442695, %v110_v7  ;;  %v228_v24 = vmul.f32 -1.442695, %v111_v8 }
  0xae   :  { %v229_v25 = vmul.f32 -1.442695, %v112_v9 }
  0xaf   :  { %237 = vpow2.f32 %v226_v13 }
  0xb0   :  { %239 = vpow2.f32 %v227_v20 }
  0xb1   :  { %241 = vpow2.f32 %v228_v24 }
  0xb2   :  { %243 = vpow2.f32 %v229_v25 }
  0xb9   :  { %v238_v26 = vpop.eup %237 }
  0xba   :  { %v240_v27 = vpop.eup %239  ;;  %v125_v28 = vadd.f32 1.0, %v238_v26 }
  0xbb   :  { %v242_v29 = vpop.eup %241  ;;  %v126_v30 = vadd.f32 1.0, %v240_v27 }
  0xbc   :  { %v244_v31 = vpop.eup %243  ;;  %245 = vrcp.f32 %v125_v28  ;;  %v127_v33 = vadd.f32 1.0, %v242_v29 }
  0xbd   :  { %247 = vrcp.f32 %v126_v30  ;;  %v128_v34 = vadd.f32 1.0, %v244_v31 }
  0xbe   :  { %249 = vrcp.f32 %v127_v33 }
  0xbf   :  { %251 = vrcp.f32 %v128_v34 }
  0xc6   :  { %v246_v38 = vpop.eup %245 }
  0xc7   :  { %v248_v39 = vpop.eup %247  ;;  %v173_v40 = vadd.f32 %v246_v38, %v146_v32  ;;  %v177_v41 = vadd.f32 %v246_v38, %v156_v36  ;;  %v175_v42 = vadd.f32 %v246_v38, %v151_v35 }
  0xc8   :  { %v250_v43 = vpop.eup %249  ;;  %v174_v44 = vadd.f32 %v248_v39, %v146_v32  ;;  %v178_v45 = vadd.f32 %v248_v39, %v156_v36  ;;  %v176_v46 = vadd.f32 %v248_v39, %v151_v35 }
  0xc9   :  { %v252_v48 = vpop.eup %251  ;;  %v185_v49 = vmul.f32 %v173_v40, %v377_v12  ;;  %v189_v50 = vmul.f32 %v177_v41, %v387_v18  ;;  %v187_v51 = vmul.f32 %v175_v42, %v385_v17  ;;  %v181_v52 = vadd.f32 %v250_v43, %v166_v47 }
  0xca   :  { %v186_v53 = vmul.f32 %v174_v44, %v379_v14  ;;  %v190_v54 = vmul.f32 %v178_v45, %v389_v19  ;;  %v188_v55 = vmul.f32 %v176_v46, %v391_v21  ;;  %v182_v56 = vadd.f32 %v252_v48, %v166_v47 }
  0xcb   :  { %201 = vst [vmem:[#allocation6 + $0x20] sm:$0xff] %v189_v50  ;;  %197 = vst [vmem:[#allocation6] sm:$0xff] %v185_v49  ;;  %v193_v58 = vmul.f32 %v181_v52, %v393_v22  ;;  %v179_v59 = vadd.f32 %v250_v43, %v161_v37  ;;  %v180_v12 = vadd.f32 %v252_v48, %v161_v37 }
  0xcc   :  { %199 = vst [vmem:[#allocation6 + $0x10] sm:$0xff] %v187_v51  ;;  %v183_v60 = vadd.f32 %v250_v43, %v171_v57  ;;  %202 = vst [vmem:[#allocation6 + $0x28] sm:$0xff] %v190_v54  ;;  %v194_v14 = vmul.f32 %v182_v56, %v395_v23  ;;  %v184_v17 = vadd.f32 %v252_v48, %v171_v57 }
  0xcd   :  { %198 = vst [vmem:[#allocation6 + $0x8] sm:$0xff] %v186_v53  ;;  %200 = vst [vmem:[#allocation6 + $0x18] sm:$0xff] %v188_v55  ;;  %v191_v18 = vmul.f32 %v179_v59, %v381_v15  ;;  %v192_v19 = vmul.f32 %v180_v12, %v383_v16 }
  0xce   :  { %205 = vst [vmem:[#allocation6 + $0x40] sm:$0xff] %v193_v58  ;;  %v195_v21 = vmul.f32 %v183_v60, %v373_v10  ;;  %206 = vst [vmem:[#allocation6 + $0x48] sm:$0xff] %v194_v14  ;;  %v196_v22 = vmul.f32 %v184_v17, %v375_v11 }
  0xcf   :  { %203 = vst [vmem:[#allocation6 + $0x30] sm:$0xff] %v191_v18  ;;  %204 = vst [vmem:[#allocation6 + $0x38] sm:$0xff] %v192_v19 }
  0xd0   :  { %207 = vst [vmem:[#allocation6 + $0x50] sm:$0xff] %v195_v21  ;;  %208 = vst [vmem:[#allocation6 + $0x58] sm:$0xff] %v196_v22 }
  0xd1   :  { %286 = shalt.err (!%p283_p12)
}
  0xd2   :  { %s287_s24 = scalar_lea.hbm %s443_s4, 1536 }
  0xd3   :  { %p288_p13 = scmp.ne.s32.totalorder %s443_s4, %s287_s24  ;;  %p291_p0 = scmp.lt.u32.totalorder %s287_s24, %s443_s4 }
  0xd5   :  { %p293_p1 = pnand %p291_p0, %p288_p13 }
  0xd7   :  { %296 = shalt.err (!%p293_p1)
}
  0xd8   :  { %220 = dma.vmem_to_hbm [thread:$0]  %s215_s20, 1536, %s443_s4, [#allocation5], %s302_s25, %s302_s25, %s303_s26  }
  0xd9   :  { %299 = dma.done.wait [#allocation5], 1536  }
  0xda   :  { %300 = vsyncadd [#allocation5], 4294965760 }
  0xdb   :  { %224 = vsyncpa [#allocation4], 1 }
  0xdc   :  { %225 = vsyncpa [#allocation5], 1 }

</bundles_post_ra>
